<compile_context>
chip_gen: v7x
topology: tpu7x:2x2x1
jax: 0.10.0
libtpu: 0.0.40
codegen_flags: <defaults>
</compile_context>

<pallas_src>
import jax
import jax.numpy as jnp
from jax.experimental import pallas as pl
from jax.experimental.pallas import tpu as pltpu


# ----------------------------- helpers --------------------------------------

def _round_up(x, m):
    return ((x + m - 1) // m) * m


def _largest_divisor_leq(n, cap):
    cap = max(1, min(n, cap))
    for d in range(cap, 0, -1):
        if n % d == 0:
            return d
    return 1


def _vmem_capacity_bytes():
    try:
        cap = int(getattr(pltpu.get_tpu_info(), "vmem_capacity_bytes"))
        if cap > 0:
            return cap
    except Exception:
        pass
    return 64 * 1024 * 1024  # conservative fallback (v7x per-TC VMEM)


def _pick_tile_min_waste(dim, candidates):
    """Candidate tile minimizing padding waste; ties -> larger tile."""
    best = None
    for t in candidates:
        waste = _round_up(dim, t) - dim
        if best is None or waste < best[0] or (waste == best[0] and t > best[1]):
            best = (waste, t)
    return best[1]


# ----------------------------- kernels ---------------------------------------

def _bmm_tn_single_k_kernel(x3_ref, x4_ref, o_ref):
    # x3_ref: (TB, K, TM), x4_ref: (TB, K, TN) -> o_ref: (TB, TM, TN)
    # Contract over K (sublane dim of both operands): transposed-LHS MXU feed,
    # no materialized transpose.  Batched via a single dot_general.
    o_ref[...] = jnp.einsum(
        "bkm,bkn->bmn", x3_ref[...], x4_ref[...],
        preferred_element_type=jnp.float32).astype(o_ref.dtype)


def _bmm_tn_multi_k_f32_kernel(x3_ref, x4_ref, o_ref):
    # f32 output: accumulate directly into the resident output block.
    k = pl.program_id(3)

    @pl.when(k == 0)
    def _():
        o_ref[...] = jnp.zeros_like(o_ref)

    o_ref[...] += jnp.einsum(
        "bkm,bkn->bmn", x3_ref[...], x4_ref[...],
        preferred_element_type=jnp.float32)


def _bmm_tn_multi_k_acc_kernel(x3_ref, x4_ref, o_ref, acc_ref):
    # Narrow output dtype: accumulate in an f32 scratch, cast once at the end.
    k = pl.program_id(3)

    @pl.when(k == 0)
    def _():
        acc_ref[...] = jnp.zeros_like(acc_ref)

    acc_ref[...] += jnp.einsum(
        "bkm,bkn->bmn", x3_ref[...], x4_ref[...],
        preferred_element_type=jnp.float32)

    @pl.when(k == pl.num_programs(3) - 1)
    def _():
        o_ref[...] = acc_ref[...].astype(o_ref.dtype)


# ----------------------------- wrapper ---------------------------------------

def permute_matmul(x3, x4, *, cast_inputs_to_bf16=False):
    """out[b] = x3[b].T @ x4[b];  x3: (B, K, M), x4: (B, K, N) -> (B, M, N)."""
    B, K, M = x3.shape
    B2, K2, N = x4.shape
    assert B == B2 and K == K2, "x3/x4 must share batch and contraction dims"

    out_dtype = jnp.promote_types(x3.dtype, x4.dtype)
    compute_dtype = jnp.bfloat16 if cast_inputs_to_bf16 else out_dtype
    x3 = x3.astype(compute_dtype)
    x4 = x4.astype(compute_dtype)

    itemsize = jnp.dtype(compute_dtype).itemsize
    out_itemsize = jnp.dtype(out_dtype).itemsize
    sub = {4: 8, 2: 16, 1: 32}.get(itemsize, 8)     # dtype-aware sublane multiple
    del sub  # candidates 128/256/384/512 are multiples of all sublane packings

    vmem_cap = _vmem_capacity_bytes()
    work_budget = vmem_cap // 3                     # double-buffered working set
    vmem_limit = (vmem_cap * 3) // 4

    # ---- M tile (lane dim of x3, sublane dim of out): prefer zero padding ----
    if M <= 256:
        TM, Mp = M, M                               # full-dim block, no pad
    else:
        TM = _pick_tile_min_waste(M, (512, 384, 256, 128))
        Mp = _round_up(M, TM)

    # ---- N tile (lane dim of x4 and of the output) ---------------------------
    if N < 64:
        TN, Np = N, N                               # tiny output: skip pad+slice
    elif N <= 128:
        TN, Np = 128, 128                           # lane-dense stores
    else:
        TN = _pick_tile_min_waste(N, (512, 384, 256, 128))
        Np = _round_up(N, TN)

    # ---- K: keep a single full K block (no accumulator / 4th axis) if it fits
    single_k_bytes = 2 * K * (TM + TN) * itemsize + 2 * TM * TN * out_itemsize
    single_k = single_k_bytes <= work_budget
    if single_k:
        TK, Kp = K, K                               # full-dim block, no pad
    else:
        TK = _pick_tile_min_waste(K, (512, 384, 256, 128))
        Kp = _round_up(K, TK)

    # ---- batch folding (amortize ~0.35us/step), capped at 8 ------------------
    per_step_1 = (2 * TK * (TM + TN) * itemsize
                  + 2 * TM * TN * out_itemsize
                  + (0 if (single_k or out_dtype == jnp.float32) else TM * TN * 4))
    TB = _largest_divisor_leq(B, min(8, max(1, work_budget // max(1, per_step_1))))

    # ---- guarantee >=2 parallel steps so both v7x TensorCores get work -------
    if (B // TB) * (Mp // TM) * (Np // TN) == 1:
        if Np >= 256 and (Np // 2) % 128 == 0:
            TN = Np // 2
        elif Mp >= 256 and (Mp // 2) % 128 == 0:
            TM = Mp // 2

    # ---- zero-pad only the dims that are actually tiled (sum is unchanged) ---
    if (Kp, Mp) != (K, M):
        x3 = jnp.pad(x3, ((0, 0), (0, Kp - K), (0, Mp - M)))
    if (Kp, Np) != (K, N):
        x4 = jnp.pad(x4, ((0, 0), (0, Kp - K), (0, Np - N)))

    cost = pl.CostEstimate(
        flops=2 * B * Mp * Np * Kp,
        transcendentals=0,
        bytes_accessed=(B * Kp * Mp * (Np // TN) * itemsize     # x3 re-read per j
                        + B * Kp * Np * (Mp // TM) * itemsize   # x4 re-read per i
                        + B * Mp * Np * out_itemsize))

    if single_k:
        grid = (B // TB, Mp // TM, Np // TN)
        kernel = _bmm_tn_single_k_kernel
        in_specs = [
            pl.BlockSpec((TB, TK, TM), lambda b, i, j: (b, 0, i)),
            pl.BlockSpec((TB, TK, TN), lambda b, i, j: (b, 0, j)),
        ]
        out_specs = pl.BlockSpec((TB, TM, TN), lambda b, i, j: (b, i, j))
        scratch_shapes = []
        dim_sem = ("parallel", "parallel", "parallel")
    else:
        grid = (B // TB, Mp // TM, Np // TN, Kp // TK)
        in_specs = [
            pl.BlockSpec((TB, TK, TM), lambda b, i, j, k: (b, k, i)),
            pl.BlockSpec((TB, TK, TN), lambda b, i, j, k: (b, k, j)),
        ]
        out_specs = pl.BlockSpec((TB, TM, TN), lambda b, i, j, k: (b, i, j))
        dim_sem = ("parallel", "parallel", "parallel", "arbitrary")
        if out_dtype == jnp.float32:
            kernel = _bmm_tn_multi_k_f32_kernel     # accumulate directly in o_ref
            scratch_shapes = []
        else:
            kernel = _bmm_tn_multi_k_acc_kernel
            scratch_shapes = [pltpu.VMEM((TB, TM, TN), jnp.float32)]

    out_p = pl.pallas_call(
        kernel,
        out_shape=jax.ShapeDtypeStruct((B, Mp, Np), out_dtype),
        grid_spec=pltpu.PrefetchScalarGridSpec(
            num_scalar_prefetch=0,
            grid=grid,
            in_specs=in_specs,
            out_specs=out_specs,
            scratch_shapes=scratch_shapes,
        ),
        compiler_params=pltpu.CompilerParams(
            dimension_semantics=dim_sem,
            vmem_limit_bytes=int(vmem_limit),
        ),
        cost_estimate=cost,
    )(x3, x4)

    if (Mp, Np) != (M, N):
        out_p = out_p[:, :M, :N]
    return out_p


def model_forward(x1, x2, x3, x4, x5):
    """Mirrors Model.forward: x1, x2, x5 feed only dead code; the returned
    value depends solely on x3 and x4."""
    # TODO(synk): v1..v5 (permute + bmm chain) are dead code whose sample
    # shapes in the original script are inconsistent; they never affect the
    # returned value and are intentionally not computed.
    return permute_matmul(x3, x4)


if __name__ == "__main__":
    key = jax.random.PRNGKey(0)
    k1, k2, k3, k4, k5 = jax.random.split(key, 5)

    # Small shapes consistent with the module's live data path
    # (x4's dims adjusted so the matmul is valid).
    x1 = jax.random.normal(k1, (1, 1024, 64), dtype=jnp.float32)  # dead-code input
    x2 = jax.random.normal(k2, (1, 64, 10), dtype=jnp.float32)    # dead-code input
    x3 = jax.random.normal(k3, (1, 10, 20), dtype=jnp.float32)
    x4 = jax.random.normal(k4, (1, 10, 32), dtype=jnp.float32)
    x5 = jax.random.normal(k5, (1, 8, 8), dtype=jnp.float32)      # dead-code input

    out = model_forward(x1, x2, x3, x4, x5)
    jax.block_until_ready(out)

    ref = jnp.matmul(jnp.transpose(x3, (0, 2, 1)), x4)
    assert out.shape == (1, 20, 32)
    assert jnp.allclose(out, ref, atol=1e-5, rtol=1e-5)

    # Extra check exercising batch folding, N padding and the two-TC split path.
    a = jax.random.normal(k1, (2, 24, 136), dtype=jnp.float32)
    b = jax.random.normal(k2, (2, 24, 160), dtype=jnp.float32)
    out2 = permute_matmul(a, b)
    jax.block_until_ready(out2)
    ref2 = jnp.einsum("bkm,bkn->bmn", a, b)
    assert out2.shape == (2, 136, 160)
    assert jnp.allclose(out2, ref2, atol=1e-3, rtol=1e-3)

    print("KERNEL_OK")
</pallas_src>

<mosaic_0001>
module attributes {stable_mosaic.version = 11 : i64} {
  func.func @_bmm_tn_single_k_kernel(%arg0: i32, %arg1: i32, %arg2: i32, %arg3: memref<1x10x20xf32, #tpu.memory_space<vmem>>, %arg4: memref<1x10x32xf32, #tpu.memory_space<vmem>>, %arg5: memref<1x20x32xf32, #tpu.memory_space<vmem>>) attributes {dimension_semantics = [#tpu.dimension_semantics<parallel>, #tpu.dimension_semantics<parallel>, #tpu.dimension_semantics<parallel>], iteration_bounds = array<i64: 1, 1, 1>, scalar_prefetch = 0 : i64, scratch_operands = 0 : i64, tpu.core_type = #tpu.core_type<tc>, window_params = [{transform_indices = @transform_0, window_bounds = array<i64: 1, 10, 20>}, {transform_indices = @transform_1, window_bounds = array<i64: 1, 10, 32>}, {transform_indices = @transform_2, window_bounds = array<i64: 1, 20, 32>}]} {
    %c0 = arith.constant 0 : index
    %c0_0 = arith.constant 0 : index
    %c0_1 = arith.constant 0 : index
    %0 = vector.load %arg3[%c0, %c0_0, %c0_1] : memref<1x10x20xf32, #tpu.memory_space<vmem>>, vector<1x10x20xf32>
    %c0_2 = arith.constant 0 : index
    %c0_3 = arith.constant 0 : index
    %c0_4 = arith.constant 0 : index
    %1 = vector.load %arg4[%c0_2, %c0_3, %c0_4] : memref<1x10x32xf32, #tpu.memory_space<vmem>>, vector<1x10x32xf32>
    "tpu.trace_start"() <{level = 10 : i32, message = "bkm,bkn->bmn"}> : () -> ()
    %cst = arith.constant dense<0.000000e+00> : vector<1x20x32xf32>
    %2 = tpu.matmul %0, %1, %cst {dimension_numbers = #tpu.dot_dimension_numbers<[1], [1], [2], [2], [0, 0, 0, 2, 1, 2], [0], [0]>} : vector<1x10x20xf32>, vector<1x10x32xf32>, vector<1x20x32xf32> -> vector<1x20x32xf32>
    "tpu.trace_stop"() : () -> ()
    %c0_5 = arith.constant 0 : index
    %c0_6 = arith.constant 0 : index
    %c0_7 = arith.constant 0 : index
    %3 = vector.load %arg5[%c0_5, %c0_6, %c0_7] : memref<1x20x32xf32, #tpu.memory_space<vmem>>, vector<1x20x32xf32>
    tpu.vector_store %arg5[%c0_5, %c0_6, %c0_7], %2 {strides = array<i32>} : memref<1x20x32xf32, #tpu.memory_space<vmem>>, vector<1x20x32xf32>,
    return
  }
  func.func @transform_0(%arg0: i32, %arg1: i32, %arg2: i32) -> (i32, i32, i32) {
    %c0_i32 = arith.constant 0 : i32
    %c0_i32_0 = arith.constant 0 : i32
    return %arg0, %c0_i32, %arg1 : i32, i32, i32
  }
  func.func @transform_1(%arg0: i32, %arg1: i32, %arg2: i32) -> (i32, i32, i32) {
    %c0_i32 = arith.constant 0 : i32
    %c0_i32_0 = arith.constant 0 : i32
    return %arg0, %c0_i32, %arg2 : i32, i32, i32
  }
  func.func @transform_2(%arg0: i32, %arg1: i32, %arg2: i32) -> (i32, i32, i32) {
    %c0_i32 = arith.constant 0 : i32
    return %arg0, %arg1, %arg2 : i32, i32, i32
  }
}

</mosaic_0001>

<bundles_post_ra>
// kernel: tpu_custom_call.1
= control target key start
LH: loop header
LB: loop body
LE: loop exit
PB: predicated region body
PF: predicated region fallthrough
CT: control target
= control target key end

     0   :  { %vm57_vm0 = vcmask 1041408   ;;  %v182_v1 = vmov 0.0|0.0   ;;  %vm183_vm1 = vmmov 1   ;;  %vm184_vm3 = vmmov 0   ;;  %s222_s0 = inlined_call_operand.vmem [shape: f32[1,10,20], index: 0, kind: input, shape index: {}]   ;;  %s223_s1 = inlined_call_operand.vmem [shape: f32[1,10,32], index: 1, kind: input, shape index: {}]   ;;  %s224_s2 = inlined_call_operand.vmem [shape: f32[1,20,32], index: 2, kind: output, shape index: {}]  }
   0x1   :  { %v11_v0 = vld [vmem:[%s222_s0] sm:$0xff]  ;;  %172 = vmatprep.subr.bf16.mxu0 %v182_v1  ;;  %176 = vmatprep.subr.bf16.mxu1 %v182_v1  ;;  %v14_v3 = vld [vmem:[%s223_s1 + $0x8] sm:$0x3]  ;;  %vm174_vm2 = vmpackc.low %vm57_vm0, %vm183_vm1  ;;  %v185_v4 = vmov 0.0   ;;  %vm47_vm4 = vcmask 80896   ;;  %vm141_vm5 = vcmask 261120  }
   0x2   :  { %v13_v2 = vld [vmem:[%s223_s1] sm:$0xff]  ;;  %15 = vxpose.xlu0.b32.start [1/2] (short) (narrow) %v11_v0, 24  ;;  %163 = vmatprep.mubr.msk.f32.mxu0 %vm184_vm3, %v185_v4  ;;  %v12_v5 = vld [vmem:[%s222_s0 + $0x8] sm:$0x3]  ;;  %vm144_vm6 = vcmask 257024  }
   0x3   :  { %v173_v6 = vpack.c.bf16 %v14_v3, %v13_v2  ;;  %166 = vmatprep.mubr.msk.f32.mxu1 %vm184_vm3, %v185_v4 }
   0x5   :  { %175 = vmatpush3.bf16.msk.msra.mxu0 %vm174_vm2, %v173_v6  ;;  %177 = vmatpush3.bf16.msk.msra.mxu1 %vm174_vm2, %v173_v6 }
   0x6   :  { %16 = vxpose.xlu0.b32.end [2/2] (short) (narrow) %v12_v5, 24 }
  0x82   :  { %v31_v7 = vpop.trf.xlu0 }
  0x83   :  { %164 = vmatmul.mubr.msk.f32.vlgmr.msra.gmra.mrb[0].mxu0 %vm47_vm4, %v31_v7 }
  0x86   :  { %v32_v8 = vpop.trf.xlu0 }
  0x87   :  { %167 = vmatmul.mubr.msk.f32.vlgmr.msra.gmra.mrb[0].mxu1 %vm47_vm4, %v32_v8 }
  0x88   :  { %169 = vmatprep.mubr.msk.f32.mxu1 %vm184_vm3, %v185_v4 }
  0x8a   :  { %v33_v9 = vpop.trf.xlu0 }
  0x8b   :  { %170 = vmatmul.mubr.msk.f32.gmra.mrb[2].mxu1 %vm47_vm4, %v33_v9 }
 0x156   :  { %v127_v10 = vpop.f32.mrb[0].mxu0 }
 0x157   :  { %142 = vst.msk [vmem:[%s224_s2] sm:$0xff] %vm141_vm5, %v127_v10  ;;  %v165_v11 = vpop.f32.mrb[1].mxu0 }
 0x15a   :  { %v132_v12 = vpop.f32.mrb[0].mxu1 }
 0x15b   :  { %143 = vst.msk [vmem:[%s224_s2 + $0x8] sm:$0xff] %vm141_vm5, %v132_v12  ;;  %v168_v13 = vpop.f32.mrb[1].mxu1 }
 0x15e   :  { %v137_v14 = vpop.f32.mrb[2].mxu1 }
 0x15f   :  { %145 = vst.msk [vmem:[%s224_s2 + $0x10] sm:$0xf] %vm144_vm6, %v137_v14  ;;  %v171_v15 = vpop.f32.mrb[3].mxu1 }

</bundles_post_ra>
